<compile_context>
chip_gen: v6e
topology: v6e:2x2x1
jax: 0.10.0
libtpu: 0.0.40
codegen_flags: <defaults>
</compile_context>

<pallas_src>
import functools
import math

import jax
import jax.numpy as jnp
from jax.experimental import pallas as pl
from jax.experimental.pallas import tpu as pltpu


LANE = 128
SUBLANE = 16  # multiple of 16 keeps both f32 (8) and bf16 (16) sublane tiling happy


def _round_up(x, m):
    return (x + m - 1) // m * m


def _choose_tile_m(B, block_m):
    """Batch tile: as large as possible (amortize per-step overhead) while still
    giving >=2 grid steps when the batch allows it (v7x megacore), rounded to the
    MXU-friendly 128 when big, sublane (16) otherwise."""
    half = -(-B // 2)
    if half >= 128:
        tm = _round_up(half, 128)
    else:
        tm = _round_up(half, SUBLANE)
    return max(SUBLANE, min(block_m, tm))


def _mlp_kernel(x_ref, w1_ref, b1_ref, w2_ref, b2_ref, w3_ref, b3_ref, o_ref):
    """Fused 3-layer MLP on one (block_m, K) tile of the batch.

    x arrives in float32 and is cast to the weight dtype (bf16) in VMEM; matmuls
    accumulate in f32 on the MXU; bias + ReLU epilogues run in f32 on the VPU
    before downcasting for the next matmul / the bf16 output store.
    """
    cdt = w1_ref.dtype  # compute dtype for MXU operands (bf16 or f32)

    x = x_ref[...].astype(cdt)

    h1 = jnp.dot(x, w1_ref[...], preferred_element_type=jnp.float32)
    h1 = jnp.maximum(h1 + b1_ref[...], 0.0).astype(cdt)

    h2 = jnp.dot(h1, w2_ref[...], preferred_element_type=jnp.float32)
    h2 = jnp.maximum(h2 + b2_ref[...], 0.0).astype(cdt)

    out = jnp.dot(h2, w3_ref[...], preferred_element_type=jnp.float32) + b3_ref[...]
    o_ref[...] = out.astype(o_ref.dtype)


def prepare_params(params, dtype=jnp.bfloat16):
    """Zero-pad weight/bias OUTPUT dims to 128-aligned shapes; cast weights to
    `dtype`.  fc1's input dim stays at the true K (784) so x needs no feature
    padding for the DMA.  Padded rows/cols are zero, so results on the original
    dims are unchanged.  Biases stay float32 so the epilogue runs in f32.
    """
    w1, b1, w2, b2, w3, b3 = params
    K, H1 = w1.shape
    H2 = w2.shape[1]
    C = w3.shape[1]
    H1p, H2p, Cp = (_round_up(d, LANE) for d in (H1, H2, C))

    def pad_w(w, rp, cp):
        r, c = w.shape
        return jnp.zeros((rp, cp), dtype).at[:r, :c].set(w.astype(dtype))

    def pad_b(b, cp):
        c = b.shape[-1]
        return jnp.zeros((1, cp), jnp.float32).at[:, :c].set(
            b.reshape(1, c).astype(jnp.float32))

    return (pad_w(w1, K, H1p), pad_b(b1, H1p),
            pad_w(w2, H1p, H2p), pad_b(b2, H2p),
            pad_w(w3, H2p, Cp), pad_b(b3, Cp))


@functools.partial(jax.jit,
                   static_argnames=("compression", "num_classes", "block_m"))
def mlp_forward(x, padded_params, *, compression, num_classes, block_m=1024):
    w1, b1, w2, b2, w3, b3 = padded_params
    K = w1.shape[0]                       # = compression (true, unpadded)
    H1p, H2p, Cp = w1.shape[1], w2.shape[1], w3.shape[1]

    xb = x.reshape(-1, compression)       # x.view(-1, compression); stays f32
    B = xb.shape[0]

    tm = _choose_tile_m(B, block_m)
    Bp = _round_up(B, tm)
    if Bp != B:
        # Only pad the ragged last tile's rows; no full cast/copy of x.
        xb = jnp.pad(xb, ((0, Bp - B), (0, 0)))

    grid = (Bp // tm,)
    out_dtype = jnp.bfloat16  # halves output write traffic; MXU still acc f32

    flops = 2 * Bp * (K * H1p + H1p * H2p + H2p * Cp)
    bytes_accessed = (
        Bp * K * xb.dtype.itemsize
        + Bp * Cp * jnp.dtype(out_dtype).itemsize
        + sum(int(p.size) * p.dtype.itemsize for p in padded_params))

    out_padded = pl.pallas_call(
        _mlp_kernel,
        out_shape=jax.ShapeDtypeStruct((Bp, Cp), out_dtype),
        grid=grid,
        in_specs=[
            # x: pipelined batch tile, full (unpadded) feature width; cast to
            # bf16 inside the kernel.
            pl.BlockSpec((tm, K), lambda i: (i, 0)),
            # Weights/biases: constant index maps -> DMA'd once, VMEM-resident.
            pl.BlockSpec(w1.shape, lambda i: (0, 0)),
            pl.BlockSpec(b1.shape, lambda i: (0, 0)),
            pl.BlockSpec(w2.shape, lambda i: (0, 0)),
            pl.BlockSpec(b2.shape, lambda i: (0, 0)),
            pl.BlockSpec(w3.shape, lambda i: (0, 0)),
            pl.BlockSpec(b3.shape, lambda i: (0, 0)),
        ],
        out_specs=pl.BlockSpec((tm, Cp), lambda i: (i, 0)),   # lane-dense output
        compiler_params=pltpu.CompilerParams(
            dimension_semantics=("parallel",),
            vmem_limit_bytes=48 * 1024 * 1024),
        cost_estimate=pl.CostEstimate(
            flops=flops, transcendentals=0, bytes_accessed=bytes_accessed),
    )(xb, w1, b1, w2, b2, w3, b3)

    # bf16 logits; slice back to the real class count and batch.
    return out_padded[:B, :num_classes]


# ----------------------------------------------------------------------------
# Parameter init matching the PyTorch module (xavier_uniform weights, default
# uniform Linear bias), stored as (in, out) so the kernel does x @ W.
# ----------------------------------------------------------------------------
def _xavier_uniform(key, fan_in, fan_out, dtype=jnp.float32):
    bound = math.sqrt(6.0 / (fan_in + fan_out))
    return jax.random.uniform(key, (fan_in, fan_out), dtype=dtype,
                              minval=-bound, maxval=bound)


def _linear_bias(key, fan_in, fan_out, dtype=jnp.float32):
    bound = 1.0 / math.sqrt(fan_in)
    return jax.random.uniform(key, (1, fan_out), dtype=dtype,
                              minval=-bound, maxval=bound)


def init_mlp_params(key, in_channel=1, im_size=28, num_classes=10,
                    fc_channel1=200, fc_channel2=200, dtype=jnp.float32):
    compression = in_channel * im_size * im_size
    k = jax.random.split(key, 6)
    w1 = _xavier_uniform(k[0], compression, fc_channel1, dtype)
    b1 = _linear_bias(k[1], compression, fc_channel1, dtype)
    w2 = _xavier_uniform(k[2], fc_channel1, fc_channel2, dtype)
    b2 = _linear_bias(k[3], fc_channel1, fc_channel2, dtype)
    w3 = _xavier_uniform(k[4], fc_channel2, num_classes, dtype)
    b3 = _linear_bias(k[5], fc_channel2, num_classes, dtype)
    return (w1, b1, w2, b2, w3, b3), compression


def _reference_forward(x, params, compression, dtype):
    """Plain-JAX reference mirroring the kernel's bf16 rounding points
    (including the bf16 output store)."""
    w1, b1, w2, b2, w3, b3 = params

    def q(a):  # round to compute dtype, then back to f32
        return a.astype(dtype).astype(jnp.float32)

    xb = q(x.reshape(-1, compression))
    h1 = q(jnp.maximum(xb @ q(w1) + b1, 0.0))
    h2 = q(jnp.maximum(h1 @ q(w2) + b2, 0.0))
    return q(h2 @ q(w3) + b3)


if __name__ == "__main__":
    key = jax.random.PRNGKey(0)
    pkey, xkey, xkey2 = jax.random.split(key, 3)

    # Module defaults: in_channel=1, im_size=28 -> compression=784, classes=10.
    num_classes = 10
    params, compression = init_mlp_params(pkey, num_classes=num_classes)
    compute_dtype = jnp.bfloat16
    padded_params = prepare_params(params, dtype=compute_dtype)

    # Small deterministic input, NCHW like PyTorch: (batch=2, 1, 28, 28).
    x = jax.random.normal(xkey, (2, 1, 28, 28), dtype=jnp.float32)
    out = mlp_forward(x, padded_params,
                      compression=compression, num_classes=num_classes)
    out = jax.block_until_ready(out)
    assert out.shape == (2, num_classes), out.shape

    ref = _reference_forward(x, params, compression, compute_dtype)
    assert jnp.allclose(out.astype(jnp.float32), ref, atol=3e-2, rtol=3e-2), \
        float(jnp.max(jnp.abs(out.astype(jnp.float32) - ref)))

    # Exercise the batch-tiled grid path (grid > 1, ragged batch).
    x2 = jax.random.normal(xkey2, (300, 1, 28, 28), dtype=jnp.float32)
    out2 = mlp_forward(x2, padded_params, compression=compression,
                       num_classes=num_classes, block_m=128)
    out2 = jax.block_until_ready(out2)
    assert out2.shape == (300, num_classes), out2.shape

    ref2 = _reference_forward(x2, params, compression, compute_dtype)
    assert jnp.allclose(out2.astype(jnp.float32), ref2, atol=3e-2, rtol=3e-2), \
        float(jnp.max(jnp.abs(out2.astype(jnp.float32) - ref2)))

    print("KERNEL_OK")
</pallas_src>

<mosaic_0001>
module attributes {stable_mosaic.version = 11 : i64} {
  func.func @_mlp_kernel(%arg0: i32, %arg1: memref<16x784xf32, #tpu.memory_space<vmem>>, %arg2: memref<784x256xbf16, #tpu.memory_space<vmem>>, %arg3: memref<1x256xf32, #tpu.memory_space<vmem>>, %arg4: memref<256x256xbf16, #tpu.memory_space<vmem>>, %arg5: memref<1x256xf32, #tpu.memory_space<vmem>>, %arg6: memref<256x128xbf16, #tpu.memory_space<vmem>>, %arg7: memref<1x128xf32, #tpu.memory_space<vmem>>, %arg8: memref<16x128xbf16, #tpu.memory_space<vmem>>) attributes {dimension_semantics = [#tpu.dimension_semantics<parallel>], iteration_bounds = array<i64: 1>, scalar_prefetch = 0 : i64, scratch_operands = 0 : i64, tpu.core_type = #tpu.core_type<tc>, window_params = [{transform_indices = @transform_0, window_bounds = array<i64: 16, 784>}, {pipeline_mode = #tpu.pipeline_mode<synchronous>, transform_indices = @transform_1, window_bounds = array<i64: 784, 256>}, {pipeline_mode = #tpu.pipeline_mode<synchronous>, transform_indices = @transform_2, window_bounds = array<i64: 1, 256>}, {pipeline_mode = #tpu.pipeline_mode<synchronous>, transform_indices = @transform_3, window_bounds = array<i64: 256, 256>}, {pipeline_mode = #tpu.pipeline_mode<synchronous>, transform_indices = @transform_4, window_bounds = array<i64: 1, 256>}, {pipeline_mode = #tpu.pipeline_mode<synchronous>, transform_indices = @transform_5, window_bounds = array<i64: 256, 128>}, {pipeline_mode = #tpu.pipeline_mode<synchronous>, transform_indices = @transform_6, window_bounds = array<i64: 1, 128>}, {transform_indices = @transform_7, window_bounds = array<i64: 16, 128>}]} {
    %c0 = arith.constant 0 : index
    %c0_0 = arith.constant 0 : index
    %0 = vector.load %arg1[%c0, %c0_0] : memref<16x784xf32, #tpu.memory_space<vmem>>, vector<16x784xf32>
    %1 = arith.truncf %0 : vector<16x784xf32> to vector<16x784xbf16>
    %c0_1 = arith.constant 0 : index
    %c0_2 = arith.constant 0 : index
    %2 = vector.load %arg2[%c0_1, %c0_2] : memref<784x256xbf16, #tpu.memory_space<vmem>>, vector<784x256xbf16>
    %cst = arith.constant dense<0.000000e+00> : vector<16x256xf32>
    %3 = tpu.matmul %1, %2, %cst {dimension_numbers = #tpu.dot_dimension_numbers<[1], [0], [0], [1], [0, 0, 1, 1], [], []>} : vector<16x784xbf16>, vector<784x256xbf16>, vector<16x256xf32> -> vector<16x256xf32>
    %c0_3 = arith.constant 0 : index
    %c0_4 = arith.constant 0 : index
    %4 = vector.load %arg3[%c0_3, %c0_4] : memref<1x256xf32, #tpu.memory_space<vmem>>, vector<1x256xf32>
    %5 = vector.broadcast %4 : vector<1x256xf32> to vector<16x256xf32>
    %6 = arith.addf %3, %5 : vector<16x256xf32>
    %cst_5 = arith.constant 0.000000e+00 : f32
    %7 = vector.broadcast %cst_5 : f32 to vector<16x256xf32>
    %8 = arith.maximumf %6, %7 : vector<16x256xf32>
    %9 = arith.truncf %8 : vector<16x256xf32> to vector<16x256xbf16>
    %c0_6 = arith.constant 0 : index
    %c0_7 = arith.constant 0 : index
    %10 = vector.load %arg4[%c0_6, %c0_7] : memref<256x256xbf16, #tpu.memory_space<vmem>>, vector<256x256xbf16>
    %cst_8 = arith.constant dense<0.000000e+00> : vector<16x256xf32>
    %11 = tpu.matmul %9, %10, %cst_8 {dimension_numbers = #tpu.dot_dimension_numbers<[1], [0], [0], [1], [0, 0, 1, 1], [], []>} : vector<16x256xbf16>, vector<256x256xbf16>, vector<16x256xf32> -> vector<16x256xf32>
    %c0_9 = arith.constant 0 : index
    %c0_10 = arith.constant 0 : index
    %12 = vector.load %arg5[%c0_9, %c0_10] : memref<1x256xf32, #tpu.memory_space<vmem>>, vector<1x256xf32>
    %13 = vector.broadcast %12 : vector<1x256xf32> to vector<16x256xf32>
    %14 = arith.addf %11, %13 : vector<16x256xf32>
    %cst_11 = arith.constant 0.000000e+00 : f32
    %15 = vector.broadcast %cst_11 : f32 to vector<16x256xf32>
    %16 = arith.maximumf %14, %15 : vector<16x256xf32>
    %17 = arith.truncf %16 : vector<16x256xf32> to vector<16x256xbf16>
    %c0_12 = arith.constant 0 : index
    %c0_13 = arith.constant 0 : index
    %18 = vector.load %arg6[%c0_12, %c0_13] : memref<256x128xbf16, #tpu.memory_space<vmem>>, vector<256x128xbf16>
    %cst_14 = arith.constant dense<0.000000e+00> : vector<16x128xf32>
    %19 = tpu.matmul %17, %18, %cst_14 {dimension_numbers = #tpu.dot_dimension_numbers<[1], [0], [0], [1], [0, 0, 1, 1], [], []>} : vector<16x256xbf16>, vector<256x128xbf16>, vector<16x128xf32> -> vector<16x128xf32>
    %c0_15 = arith.constant 0 : index
    %c0_16 = arith.constant 0 : index
    %20 = vector.load %arg7[%c0_15, %c0_16] : memref<1x128xf32, #tpu.memory_space<vmem>>, vector<1x128xf32>
    %21 = vector.broadcast %20 : vector<1x128xf32> to vector<16x128xf32>
    %22 = arith.addf %19, %21 : vector<16x128xf32>
    %23 = arith.truncf %22 : vector<16x128xf32> to vector<16x128xbf16>
    %c0_17 = arith.constant 0 : index
    %c0_18 = arith.constant 0 : index
    %24 = vector.load %arg8[%c0_17, %c0_18] : memref<16x128xbf16, #tpu.memory_space<vmem>>, vector<16x128xbf16>
    tpu.vector_store %arg8[%c0_17, %c0_18], %23 {strides = array<i32>} : memref<16x128xbf16, #tpu.memory_space<vmem>>, vector<16x128xbf16>,
    return
  }
  func.func @transform_0(%arg0: i32) -> (i32, i32) {
    %c0_i32 = arith.constant 0 : i32
    %c0_i32_0 = arith.constant 0 : i32
    return %arg0, %c0_i32 : i32, i32
  }
  func.func @transform_1(%arg0: i32) -> (i32, i32) {
    %c0_i32 = arith.constant 0 : i32
    %c0_i32_0 = arith.constant 0 : i32
    %c0_i32_1 = arith.constant 0 : i32
    return %c0_i32, %c0_i32_0 : i32, i32
  }
  func.func @transform_2(%arg0: i32) -> (i32, i32) {
    %c0_i32 = arith.constant 0 : i32
    %c0_i32_0 = arith.constant 0 : i32
    %c0_i32_1 = arith.constant 0 : i32
    return %c0_i32, %c0_i32_0 : i32, i32
  }
  func.func @transform_3(%arg0: i32) -> (i32, i32) {
    %c0_i32 = arith.constant 0 : i32
    %c0_i32_0 = arith.constant 0 : i32
    %c0_i32_1 = arith.constant 0 : i32
    return %c0_i32, %c0_i32_0 : i32, i32
  }
  func.func @transform_4(%arg0: i32) -> (i32, i32) {
    %c0_i32 = arith.constant 0 : i32
    %c0_i32_0 = arith.constant 0 : i32
    %c0_i32_1 = arith.constant 0 : i32
    return %c0_i32, %c0_i32_0 : i32, i32
  }
  func.func @transform_5(%arg0: i32) -> (i32, i32) {
    %c0_i32 = arith.constant 0 : i32
    %c0_i32_0 = arith.constant 0 : i32
    %c0_i32_1 = arith.constant 0 : i32
    return %c0_i32, %c0_i32_0 : i32, i32
  }
  func.func @transform_6(%arg0: i32) -> (i32, i32) {
    %c0_i32 = arith.constant 0 : i32
    %c0_i32_0 = arith.constant 0 : i32
    %c0_i32_1 = arith.constant 0 : i32
    return %c0_i32, %c0_i32_0 : i32, i32
  }
  func.func @transform_7(%arg0: i32) -> (i32, i32) {
    %c0_i32 = arith.constant 0 : i32
    %c0_i32_0 = arith.constant 0 : i32
    return %arg0, %c0_i32 : i32, i32
  }
}

</mosaic_0001>

<bundles_post_ra>
// kernel: mlp_forward.1
= control target key start
LH: loop header
LB: loop body
LE: loop exit
PB: predicated region body
PF: predicated region fallthrough
CT: control target
= control target key end

     0   :  { %12 = vsyncpa [#allocation3], 0  ;;  %s1947_s0 = inlined_call_operand.vmem [shape: f32[16,784], index: 0, kind: input, shape index: {}]   ;;  %s1948_s1 = inlined_call_operand.hbm [shape: bf16[784,256], index: 1, kind: input, shape index: {}]   ;;  %s1949_s2 = inlined_call_operand.vmem [shape: f32[1,256], index: 2, kind: input, shape index: {}]   ;;  %s1950_s3 = inlined_call_operand.vmem [shape: bf16[256,256], index: 3, kind: input, shape index: {}]   ;;  %s1951_s4 = inlined_call_operand.vmem [shape: f32[1,256], index: 4, kind: input, shape index: {}]   ;;  %s1952_s5 = inlined_call_operand.hbm [shape: bf16[256,128], index: 5, kind: input, shape index: {}]   ;;  %s1953_s6 = inlined_call_operand.vmem [shape: f32[1,128], index: 6, kind: input, shape index: {}]   ;;  %s1954_s7 = inlined_call_operand.vmem [shape: bf16[16,128], index: 7, kind: output, shape index: {}]  }
   0x1   :  { %13 = vsyncpa [#allocation5], 0  ;;  %s1744_s24 = smov [#allocation2]  }
   0x2   :  { %s21_s25 = sshll.u32 %s1744_s24, 4  ;;  %s22_s25 = int_to_ptr.vmem [resolvable:$true] %s21_s25 }
   0x3   :  { %s1708_s26 = scalar_lea.vmem %s22_s25, 12544  ;;  %p1713_p1 = scmp.lt.s32.totalorder %s22_s25, %s22_s25 }
   0x4   :  { %p1709_p0 = scmp.ne.s32.totalorder %s22_s25, %s1708_s26  ;;  %p1714_p2 = scmp.lt.s32.totalorder %s1708_s26, %s1708_s26 }
   0x6   :  { %p1715_p3 = por %p1714_p2, %p1713_p1 }
   0x8   :  { %p1716_p4 = pnand %p1715_p3, %p1709_p0 }
   0xa   :  { %1719 = shalt.err (!%p1716_p4)
}
   0xb   :  { %s1745_s27 = smov 128   ;;  %s1746_s28 = smov 8  }
   0xc   :  { %27 = dma.hbm_to_vmem [thread:$0]  %s1948_s1, 12544, %s22_s25, [#allocation3], %s1745_s27, %s1745_s27, %s1746_s28  }
   0xd   :  { %s1747_s8 = smov [#allocation4]  }
   0xe   :  { %s39_s9 = sshll.u32 %s1747_s8, 4  ;;  %s40_s9 = int_to_ptr.vmem [resolvable:$true] %s39_s9 }
   0xf   :  { %s1728_s10 = scalar_lea.vmem %s40_s9, 2048  ;;  %p1733_p6 = scmp.lt.s32.totalorder %s40_s9, %s40_s9 }
  0x10   :  { %p1729_p5 = scmp.ne.s32.totalorder %s40_s9, %s1728_s10  ;;  %p1734_p7 = scmp.lt.s32.totalorder %s1728_s10, %s1728_s10 }
  0x12   :  { %p1735_p8 = por %p1734_p7, %p1733_p6 }
  0x14   :  { %p1736_p9 = pnand %p1735_p8, %p1729_p5 }
  0x16   :  { %1739 = shalt.err (!%p1736_p9)
}
  0x17   :  { %s1748_s11 = smov 64   ;;  %s1749_s12 = smov 4  }
  0x18   :  { %45 = dma.hbm_to_vmem [thread:$0]  %s1952_s5, 2048, %s40_s9, [#allocation5], %s1748_s11, %s1748_s11, %s1749_s12  }
  0x19   :  { %1740 = dma.done.wait [#allocation3], 12544  }
  0x1a   :  { %1741 = vsyncadd [#allocation3], 4294954752 }
  0x1b   :  { %1742 = dma.done.wait [#allocation5], 2048  }
  0x1c   :  { %1743 = vsyncadd [#allocation5], 4294965248  ;;  %v1489_v0 = vld [vmem:[#allocation2 + $0x74] ss:$8 sps:$4 sm:$0xff]   ;;  %v1491_v1 = vld [vmem:[#allocation2 + $0x70] ss:$8 sps:$4 sm:$0xff]  }
  0x1d   :  { %680 = vmatprep.subr.bf16.mxu0 %v1489_v0  ;;  %v1492_v2 = vld [vmem:[#allocation2 + $0x174] ss:$8 sps:$4 sm:$0xff]   ;;  %v1494_v3 = vld [vmem:[#allocation2 + $0x170] ss:$8 sps:$4 sm:$0xff]   ;;  %v1495_v4 = vld [vmem:[#allocation2 + $0x64] ss:$8 sps:$4 sm:$0xff]  }
  0x1e   :  { %681 = vmatpush1.bf16.msra.mxu0 %v1491_v1  ;;  %v1497_v5 = vld [vmem:[#allocation2 + $0x60] ss:$8 sps:$4 sm:$0xff]   ;;  %723 = vmatprep.subr.bf16.mxu1 %v1492_v2  ;;  %v1498_v6 = vld [vmem:[#allocation2 + $0x164] ss:$8 sps:$4 sm:$0xff]   ;;  %v1501_v8 = vld [vmem:[#allocation2 + $0x54] ss:$8 sps:$4 sm:$0xff]  }
  0x1f   :  { %724 = vmatpush1.bf16.msra.mxu1 %v1494_v3  ;;  %682 = vmatprep.subr.bf16.mxu0 %v1495_v4  ;;  %v1500_v7 = vld [vmem:[#allocation2 + $0x160] ss:$8 sps:$4 sm:$0xff]   ;;  %v1503_v9 = vld [vmem:[#allocation2 + $0x50] ss:$8 sps:$4 sm:$0xff]   ;;  %v1504_v10 = vld [vmem:[#allocation2 + $0x154] ss:$8 sps:$4 sm:$0xff]  }
  0x20   :  { %725 = vmatprep.subr.bf16.mxu1 %v1498_v6  ;;  %v1507_v11 = vld [vmem:[#allocation2 + $0x44] ss:$8 sps:$4 sm:$0xff]   ;;  %v1506_v12 = vld [vmem:[#allocation2 + $0x150] ss:$8 sps:$4 sm:$0xff]   ;;  %v1509_v14 = vld [vmem:[#allocation2 + $0x40] ss:$8 sps:$4 sm:$0xff]  }
  0x21   :  { %v1510_v13 = vld [vmem:[#allocation2 + $0x144] ss:$8 sps:$4 sm:$0xff]   ;;  %v1513_v15 = vld [vmem:[#allocation2 + $0x34] ss:$8 sps:$4 sm:$0xff]   ;;  %v1512_v16 = vld [vmem:[#allocation2 + $0x140] ss:$8 sps:$4 sm:$0xff]  }
  0x22   :  { %683 = vmatpush1.bf16.msra.mxu0 %v1497_v5  ;;  %v1516_v17 = vld [vmem:[#allocation2 + $0x134] ss:$8 sps:$4 sm:$0xff]   ;;  %v1515_v18 = vld [vmem:[#allocation2 + $0x30] ss:$8 sps:$4 sm:$0xff]   ;;  %v1519_v19 = vld [vmem:[#allocation2 + $0x24] ss:$8 sps:$4 sm:$0xff]  }
  0x23   :  { %684 = vmatprep.subr.bf16.mxu0 %v1501_v8  ;;  %726 = vmatpush1.bf16.msra.mxu1 %v1500_v7  ;;  %v1518_v20 = vld [vmem:[#allocation2 + $0x130] ss:$8 sps:$4 sm:$0xff]   ;;  %v1522_v21 = vld [vmem:[#allocation2 + $0x124] ss:$8 sps:$4 sm:$0xff]   ;;  %v1521_v22 = vld [vmem:[#allocation2 + $0x20] ss:$8 sps:$4 sm:$0xff]  }
  0x24   :  { %727 = vmatprep.subr.bf16.mxu1 %v1504_v10  ;;  %v1525_v23 = vld [vmem:[#allocation2 + $0x14] ss:$8 sps:$4 sm:$0xff]   ;;  %v1524_v24 = vld [vmem:[#allocation2 + $0x120] ss:$8 sps:$4 sm:$0xff]   ;;  %v1527_v26 = vld [vmem:[#allocation2 + $0x10] ss:$8 sps:$4 sm:$0xff]  }
  0x25   :  { %v1528_v25 = vld [vmem:[#allocation2 + $0x114] ss:$8 sps:$4 sm:$0xff]   ;;  %v1531_v27 = vld [vmem:[#allocation2 + $0x4] ss:$8 sps:$4 sm:$0xff]   ;;  %v1530_v28 = vld [vmem:[#allocation2 + $0x110] ss:$8 sps:$4 sm:$0xff]  }
  0x26   :  { %685 = vmatpush1.bf16.msra.mxu0 %v1503_v9  ;;  %v1534_v29 = vld [vmem:[#allocation2 + $0x104] ss:$8 sps:$4 sm:$0xff]   ;;  %v1533_v30 = vld [vmem:[#allocation2] ss:$8 sps:$4 sm:$0xff]   ;;  %v1537_v31 = vld [vmem:[#allocation2 + $0xf4] ss:$8 sps:$4 sm:$0xff]  }
  0x27   :  { %686 = vmatprep.subr.bf16.mxu0 %v1507_v11  ;;  %728 = vmatpush1.bf16.msra.mxu1 %v1506_v12  ;;  %v1536_v32 = vld [vmem:[#allocation2 + $0x100] ss:$8 sps:$4 sm:$0xff]   ;;  %v1540_v33 = vld [vmem:[#allocation2 + $0x1f4] ss:$8 sps:$4 sm:$0xff]   ;;  %v1539_v34 = vld [vmem:[#allocation2 + $0xf0] ss:$8 sps:$4 sm:$0xff]  }
  0x28   :  { %729 = vmatprep.subr.bf16.mxu1 %v1510_v13  ;;  %v1543_v35 = vld [vmem:[#allocation2 + $0xe4] ss:$8 sps:$4 sm:$0xff]   ;;  %v1542_v36 = vld [vmem:[#allocation2 + $0x1f0] ss:$8 sps:$4 sm:$0xff]   ;;  %v1545_v38 = vld [vmem:[#allocation2 + $0xe0] ss:$8 sps:$4 sm:$0xff]  }
  0x29   :  { %v1546_v37 = vld [vmem:[#allocation2 + $0x1e4] ss:$8 sps:$4 sm:$0xff]   ;;  %v1549_v39 = vld [vmem:[#allocation2 + $0xd4] ss:$8 sps:$4 sm:$0xff]   ;;  %v1548_v40 = vld [vmem:[#allocation2 + $0x1e0] ss:$8 sps:$4 sm:$0xff]  }
  0x2a   :  { %687 = vmatpush1.bf16.msra.mxu0 %v1509_v14  ;;  %v1552_v41 = vld [vmem:[#allocation2 + $0x1d4] ss:$8 sps:$4 sm:$0xff]   ;;  %v1551_v42 = vld [vmem:[#allocation2 + $0xd0] ss:$8 sps:$4 sm:$0xff]   ;;  %v1555_v43 = vld [vmem:[#allocation2 + $0xc4] ss:$8 sps:$4 sm:$0xff]  }
  0x2b   :  { %688 = vmatprep.subr.bf16.mxu0 %v1513_v15  ;;  %730 = vmatpush1.bf16.msra.mxu1 %v1512_v16  ;;  %v1554_v44 = vld [vmem:[#allocation2 + $0x1d0] ss:$8 sps:$4 sm:$0xff]   ;;  %v1558_v45 = vld [vmem:[#allocation2 + $0x1c4] ss:$8 sps:$4 sm:$0xff]   ;;  %v1557_v48 = vld [vmem:[#allocation2 + $0xc0] ss:$8 sps:$4 sm:$0xff]  }
  0x2c   :  { %731 = vmatprep.subr.bf16.mxu1 %v1516_v17  ;;  %v56_v46 = vld [vmem:[%s1947_s0 + $0x8] sm:$0xff]  ;;  %v63_v47 = vld [vmem:[%s1947_s0 + $0x40] sm:$0xff]  ;;  %v1561_v50 = vld [vmem:[#allocation2 + $0xb4] ss:$8 sps:$4 sm:$0xff]   ;;  %vm676_vm0 = vcmask 130048  }
  0x2d   :  { %v70_v49 = vpack.c.bf16 %v63_v47, %v56_v46  ;;  %v1560_v51 = vld [vmem:[#allocation2 + $0x1c0] ss:$8 sps:$4 sm:$0xff]   ;;  %v58_v52 = vld [vmem:[%s1947_s0 + $0x18] sm:$0xff]  ;;  %v65_v53 = vld [vmem:[%s1947_s0 + $0x50] sm:$0xff] }
  0x2e   :  { %689 = vmatpush1.bf16.msra.mxu0 %v1515_v18  ;;  %v1564_v54 = vld [vmem:[#allocation2 + $0x1b4] ss:$8 sps:$4 sm:$0xff]   ;;  %v72_v55 = vpack.c.bf16 %v65_v53, %v58_v52  ;;  %v1563_v56 = vld [vmem:[#allocation2 + $0xb0] ss:$8 sps:$4 sm:$0xff]   ;;  %v1567_v57 = vld [vmem:[#allocation2 + $0xa4] ss:$8 sps:$4 sm:$0xff]  }
  0x2f   :  { %690 = vmatprep.subr.bf16.mxu0 %v1519_v19  ;;  %732 = vmatpush1.bf16.msra.mxu1 %v1518_v20  ;;  %v1566_v58 = vld [vmem:[#allocation2 + $0x1b0] ss:$8 sps:$4 sm:$0xff]   ;;  %v1570_v59 = vld [vmem:[#allocation2 + $0x1a4] ss:$8 sps:$4 sm:$0xff]   ;;  %v1569_v60 = vld [vmem:[#allocation2 + $0xa0] ss:$8 sps:$4 sm:$0xff]  }
  0x30   :  { %733 = vmatprep.subr.bf16.mxu1 %v1522_v21  ;;  %712 = vmatprep.mubr.bf16.mxu0 %v70_v49  ;;  %v1573_v61 = vld [vmem:[#allocation2 + $0x94] ss:$8 sps:$4 sm:$0xff]   ;;  %v1572_v62 = vld [vmem:[#allocation2 + $0x1a0] ss:$8 sps:$4 sm:$0xff]   ;;  %v1575_v0 = vld [vmem:[#allocation2 + $0x90] ss:$8 sps:$4 sm:$0xff]  }
  0x31   :  { %755 = vmatprep.mubr.bf16.mxu1 %v72_v55  ;;  %v1576_v63 = vld [vmem:[#allocation2 + $0x194] ss:$8 sps:$4 sm:$0xff]   ;;  %v1578_v1 = vld [vmem:[#allocation2 + $0x190] ss:$8 sps:$4 sm:$0xff]   ;;  %v1579_v2 = vld [vmem:[#allocation2 + $0x84] ss:$8 sps:$4 sm:$0xff]  }
  0x32   :  { %691 = vmatpush1.bf16.msra.mxu0 %v1521_v22  ;;  %v1581_v3 = vld [vmem:[#allocation2 + $0x80] ss:$8 sps:$4 sm:$0xff]   ;;  %v1582_v4 = vld [vmem:[#allocation2 + $0x184] ss:$8 sps:$4 sm:$0xff]   ;;  %v62_v7 = vld [vmem:[%s1947_s0 + $0x38] sm:$0xff]  ;;  %v1750_v21 = vmov 0  }
  0x33   :  { %692 = vmatprep.subr.bf16.mxu0 %v1525_v23  ;;  %734 = vmatpush1.bf16.msra.mxu1 %v1524_v24  ;;  %v55_v5 = vld [vmem:[%s1947_s0] sm:$0xff]  ;;  %v1587_v8 = vld [vmem:[#allocation2 + $0x274] ss:$8 sps:$4 sm:$0xff]   ;;  %v64_v10 = vld [vmem:[%s1947_s0 + $0x48] sm:$0xff] }
  0x34   :  { %735 = vmatprep.subr.bf16.mxu1 %v1528_v25  ;;  %v1584_v6 = vld [vmem:[#allocation2 + $0x180] ss:$8 sps:$4 sm:$0xff]   ;;  %v57_v9 = vld [vmem:[%s1947_s0 + $0x10] sm:$0xff]  ;;  %v69_v11 = vpack.c.bf16 %v62_v7, %v55_v5  ;;  %v1590_v14 = vld [vmem:[#allocation2 + $0x264] ss:$8 sps:$4 sm:$0xff]  }
  0x35   :  { %v1585_v12 = vld [vmem:[#allocation2 + $0x270] ss:$8 sps:$4 sm:$0xff]   ;;  %v71_v13 = vpack.c.bf16 %v64_v10, %v57_v9  ;;  %v1630_v15 = vld [vmem:[#allocation2 + $0x300] ss:$8 sps:$4 sm:$0xff]   ;;  %v1632_v16 = vld [vmem:[#allocation2 + $0x304] ss:$8 sps:$4 sm:$0xff]  }
  0x36   :  { %693 = vmatpush1.bf16.msra.mxu0 %v1527_v26  ;;  %v1588_v17 = vld [vmem:[#allocation2 + $0x260] ss:$8 sps:$4 sm:$0xff]   ;;  %v1593_v18 = vld [vmem:[#allocation2 + $0x254] ss:$8 sps:$4 sm:$0xff]   ;;  %v1591_v20 = vld [vmem:[#allocation2 + $0x250] ss:$8 sps:$4 sm:$0xff]  }
  0x37   :  { %694 = vmatprep.subr.bf16.mxu0 %v1531_v27  ;;  %736 = vmatpush1.bf16.msra.mxu1 %v1530_v28  ;;  %v60_v19 = vld [vmem:[%s1947_s0 + $0x28] sm:$0xff]  ;;  %v61_v22 = vld [vmem:[%s1947_s0 + $0x30] sm:$0xff]  ;;  %v67_v24 = vld [vmem:[%s1947_s0 + $0x60] sm:$0xff] }
  0x38   :  { %737 = vmatprep.subr.bf16.mxu1 %v1534_v29  ;;  %v68_v23 = vld [vmem:[%s1947_s0 + $0x68] sm:$0xff]  ;;  %v74_v26 = vpack.c.bf16 %v67_v24, %v60_v19  ;;  %v1599_v29 = vld [vmem:[#allocation2 + $0x234] ss:$8 sps:$4 sm:$0xff]   ;;  %v1621_v46 = vld [vmem:[#allocation2 + $0x2b0] ss:$8 sps:$4 sm:$0xff]  }
  0x39   :  { %v1596_v25 = vld [vmem:[#allocation2 + $0x244] ss:$8 sps:$4 sm:$0xff]   ;;  %v75_v27 = vpack.c.bf16 %v68_v23, %v61_v22  ;;  %v1594_v28 = vld [vmem:[#allocation2 + $0x240] ss:$8 sps:$4 sm:$0xff]   ;;  %v1629_v49 = vld [vmem:[#allocation2 + $0x294] ss:$8 sps:$4 sm:$0xff]  }
  0x3a   :  { %695 = vmatpush1.bf16.msra.mxu0 %v1533_v30  ;;  %v1597_v30 = vld [vmem:[#allocation2 + $0x230] ss:$8 sps:$4 sm:$0xff]   ;;  %v1626_v47 = vld [vmem:[#allocation2 + $0x2a4] ss:$8 sps:$4 sm:$0xff]   ;;  %v1633_v52 = vld [vmem:[#allocation2 + $0x280] ss:$8 sps:$4 sm:$0xff]  }
  0x3b   :  { %696 = vmatprep.subr.bf16.mxu0 %v1537_v31  ;;  %738 = vmatpush1.bf16.msra.mxu1 %v1536_v32  ;;  %v1602_v31 = vld [vmem:[#allocation2 + $0x224] ss:$8 sps:$4 sm:$0xff]   ;;  %v1600_v32 = vld [vmem:[#allocation2 + $0x220] ss:$8 sps:$4 sm:$0xff]   ;;  %v1654_v5 = vld [vmem:[%s1950_s3 + $0x10] ss:$8 sps:$4 sm:$0xff]  }
  0x3c   :  { %739 = vmatprep.subr.bf16.mxu1 %v1540_v33  ;;  %v1605_v33 = vld [vmem:[#allocation2 + $0x214] ss:$8 sps:$4 sm:$0xff]   ;;  %v59_v53 = vld [vmem:[%s1947_s0 + $0x20] sm:$0xff]  ;;  %v1660_v9 = vld [vmem:[%s1950_s3 + $0xf0] ss:$8 sps:$4 sm:$0xff]  }
  0x3d   :  { %v1657_v7 = vld [vmem:[%s1950_s3] ss:$8 sps:$4 sm:$0xff]   ;;  %v1665_v10 = vld [vmem:[%s1950_s3 + $0xe4] ss:$8 sps:$4 sm:$0xff]  }
  0x3e   :  { %697 = vmatpush2.bf16.msra.mxu0 %v1539_v34  ;;  %v1603_v34 = vld [vmem:[#allocation2 + $0x210] ss:$8 sps:$4 sm:$0xff]   ;;  %v1675_v19 = vld [vmem:[%s1950_s3 + $0xa0] ss:$8 sps:$4 sm:$0xff]   ;;  %v1683_v22 = vld [vmem:[%s1950_s3 + $0x84] ss:$8 sps:$4 sm:$0xff]  }
  0x3f   :  { %698 = vmatprep.subr.bf16.mxu0 %v1543_v35  ;;  %740 = vmatpush2.bf16.msra.mxu1 %v1542_v36  ;;  %v1608_v35 = vld [vmem:[#allocation2 + $0x204] ss:$8 sps:$4 sm:$0xff]   ;;  %v1606_v36 = vld [vmem:[#allocation2 + $0x200] ss:$8 sps:$4 sm:$0xff]  }
  0x40   :  { %741 = vmatprep.subr.bf16.mxu1 %v1546_v37  ;;  %v1611_v37 = vld [vmem:[#allocation2 + $0x2f4] ss:$8 sps:$4 sm:$0xff]   ;;  %v1681_v23 = vld [vmem:[%s1950_s3 + $0x80] ss:$8 sps:$4 sm:$0xff]  }
  0x41   :  { %v1684_v24 = vld [vmem:[#allocation4 + $0x78] sm:$0xff]  }
  0x42   :  { %699 = vmatpush2.bf16.msra.mxu0 %v1545_v38  ;;  %v1609_v38 = vld [vmem:[#allocation2 + $0x2f0] ss:$8 sps:$4 sm:$0xff]  }
  0x43   :  { %700 = vmatprep.subr.bf16.mxu0 %v1549_v39  ;;  %742 = vmatpush2.bf16.msra.mxu1 %v1548_v40  ;;  %v1614_v39 = vld [vmem:[#allocation2 + $0x2e4] ss:$8 sps:$4 sm:$0xff]   ;;  %v1612_v40 = vld [vmem:[#allocation2 + $0x2e0] ss:$8 sps:$4 sm:$0xff]  }
  0x44   :  { %743 = vmatprep.subr.bf16.mxu1 %v1552_v41  ;;  %v1617_v41 = vld [vmem:[#allocation2 + $0x2d4] ss:$8 sps:$4 sm:$0xff]  }
  0x46   :  { %701 = vmatpush2.bf16.msra.mxu0 %v1551_v42  ;;  %v1615_v42 = vld [vmem:[#allocation2 + $0x2d0] ss:$8 sps:$4 sm:$0xff]  }
  0x47   :  { %702 = vmatprep.subr.bf16.mxu0 %v1555_v43  ;;  %744 = vmatpush2.bf16.msra.mxu1 %v1554_v44  ;;  %v1620_v43 = vld [vmem:[#allocation2 + $0x2c4] ss:$8 sps:$4 sm:$0xff]   ;;  %v1618_v44 = vld [vmem:[#allocation2 + $0x2c0] ss:$8 sps:$4 sm:$0xff]  }
  0x48   :  { %745 = vmatprep.subr.bf16.mxu1 %v1558_v45  ;;  %v1623_v45 = vld [vmem:[#allocation2 + $0x2b4] ss:$8 sps:$4 sm:$0xff]  }
  0x4a   :  { %703 = vmatpush2.bf16.msra.mxu0 %v1557_v48  ;;  %v1624_v48 = vld [vmem:[#allocation2 + $0x2a0] ss:$8 sps:$4 sm:$0xff]  }
  0x4b   :  { %704 = vmatprep.subr.bf16.mxu0 %v1561_v50  ;;  %746 = vmatpush2.bf16.msra.mxu1 %v1560_v51  ;;  %v1627_v50 = vld [vmem:[#allocation2 + $0x290] ss:$8 sps:$4 sm:$0xff]   ;;  %v1635_v51 = vld [vmem:[#allocation2 + $0x284] ss:$8 sps:$4 sm:$0xff]  }
  0x4c   :  { %747 = vmatprep.subr.bf16.mxu1 %v1564_v54  ;;  %v66_v54 = vld [vmem:[%s1947_s0 + $0x58] sm:$0xff] }
  0x4d   :  { %v73_v55 = vpack.c.bf16 %v66_v54, %v59_v53 }
  0x4e   :  { %705 = vmatpush2.bf16.msra.mxu0 %v1563_v56  ;;  %v1636_v56 = vld [vmem:[%s1950_s3 + $0x70] ss:$8 sps:$4 sm:$0xff]  }
  0x4f   :  { %706 = vmatprep.subr.bf16.mxu0 %v1567_v57  ;;  %748 = vmatpush2.bf16.msra.mxu1 %v1566_v58  ;;  %v1638_v57 = vld [vmem:[%s1950_s3 + $0x74] ss:$8 sps:$4 sm:$0xff]   ;;  %v1641_v58 = vld [vmem:[%s1950_s3 + $0x64] ss:$8 sps:$4 sm:$0xff]  }
  0x50   :  { %749 = vmatprep.subr.bf16.mxu1 %v1570_v59  ;;  %v1639_v59 = vld [vmem:[%s1950_s3 + $0x60] ss:$8 sps:$4 sm:$0xff]  }
  0x52   :  { %707 = vmatpush2.bf16.msra.mxu0 %v1569_v60  ;;  %v1644_v60 = vld [vmem:[%s1950_s3 + $0x54] ss:$8 sps:$4 sm:$0xff]  }
  0x53   :  { %708 = vmatprep.subr.bf16.mxu0 %v1573_v61  ;;  %750 = vmatpush2.bf16.msra.mxu1 %v1572_v62  ;;  %v1642_v61 = vld [vmem:[%s1950_s3 + $0x50] ss:$8 sps:$4 sm:$0xff]   ;;  %v1647_v62 = vld [vmem:[%s1950_s3 + $0x44] ss:$8 sps:$4 sm:$0xff]  }
  0x54   :  { %751 = vmatprep.subr.bf16.mxu1 %v1576_v63  ;;  %v1645_v63 = vld [vmem:[%s1950_s3 + $0x40] ss:$8 sps:$4 sm:$0xff]  }
  0x56   :  { %709 = vmatpush2.bf16.msra.mxu0 %v1575_v0  ;;  %v1650_v0 = vld [vmem:[%s1950_s3 + $0x34] ss:$8 sps:$4 sm:$0xff]  }
  0x57   :  { %710 = vmatprep.subr.bf16.mxu0 %v1579_v2  ;;  %752 = vmatpush2.bf16.msra.mxu1 %v1578_v1  ;;  %v1648_v1 = vld [vmem:[%s1950_s3 + $0x30] ss:$8 sps:$4 sm:$0xff]   ;;  %v1653_v2 = vld [vmem:[%s1950_s3 + $0x24] ss:$8 sps:$4 sm:$0xff]  }
  0x58   :  { %753 = vmatprep.subr.bf16.mxu1 %v1582_v4  ;;  %v1656_v4 = vld [vmem:[%s1950_s3 + $0x14] ss:$8 sps:$4 sm:$0xff]  }
  0x5a   :  { %711 = vmatpush2.bf16.msra.mxu0 %v1581_v3  ;;  %v1651_v3 = vld [vmem:[%s1950_s3 + $0x20] ss:$8 sps:$4 sm:$0xff]  }
  0x5b   :  { %766 = vmatprep.subr.bf16.mxu0 %v1587_v8  ;;  %754 = vmatpush2.bf16.msra.mxu1 %v1584_v6  ;;  %v1659_v6 = vld [vmem:[%s1950_s3 + $0x4] ss:$8 sps:$4 sm:$0xff]   ;;  %v1662_v8 = vld [vmem:[%s1950_s3 + $0xf4] ss:$8 sps:$4 sm:$0xff]  }
  0x5c   :  { %823 = vmatprep.subr.bf16.mxu1 %v1632_v16  ;;  %v1674_v16 = vld [vmem:[%s1950_s3 + $0xb4] ss:$8 sps:$4 sm:$0xff]  }
  0x5d   :  { %713 = vmatmul.mubr.bf16.vlgmr.msra.gmra.mxu0 %v69_v11  ;;  %v1663_v11 = vld [vmem:[%s1950_s3 + $0xe0] ss:$8 sps:$4 sm:$0xff]  }
  0x5e   :  { %767 = vmatpush1.bf16.msra.mxu0 %v1585_v12  ;;  %756 = vmatmul.mubr.bf16.vlgmr.msra.gmra.mxu1 %v71_v13  ;;  %v1668_v12 = vld [vmem:[%s1950_s3 + $0xd4] ss:$8 sps:$4 sm:$0xff]   ;;  %v1666_v13 = vld [vmem:[%s1950_s3 + $0xd0] ss:$8 sps:$4 sm:$0xff]  }
  0x5f   :  { %768 = vmatprep.subr.bf16.mxu0 %v1590_v14  ;;  %841 = vmatprep.mubr.bf16.mxu1 %v1750_v21  ;;  %v1671_v14 = vld [vmem:[%s1950_s3 + $0xc4] ss:$8 sps:$4 sm:$0xff]   ;;  %v1678_v21 = vld [vmem:[%s1950_s3 + $0x90] ss:$8 sps:$4 sm:$0xff]  }
  0x60   :  { %824 = vmatpush1.bf16.msra.mxu1 %v1630_v15  ;;  %798 = vmatprep.mubr.bf16.mxu0 %v74_v26  ;;  %v1669_v15 = vld [vmem:[%s1950_s3 + $0xc0] ss:$8 sps:$4 sm:$0xff]  }
  0x61   :  { %1062 = vmatprep.subr.bf16.mxu1 %v1638_v57  ;;  %v1686_v26 = vld [vmem:[#allocation4 + $0x70] sm:$0xff]  }
  0x62   :  { %769 = vmatpush1.bf16.msra.mxu0 %v1588_v17  ;;  %v1672_v17 = vld [vmem:[%s1950_s3 + $0xb0] ss:$8 sps:$4 sm:$0xff]  }
  0x63   :  { %770 = vmatprep.subr.bf16.mxu0 %v1593_v18  ;;  %v1677_v18 = vld [vmem:[%s1950_s3 + $0xa4] ss:$8 sps:$4 sm:$0xff]  }
  0x66   :  { %771 = vmatpush1.bf16.msra.mxu0 %v1591_v20  ;;  %1401 = vmatmul.mubr.msk.bf16.vlgmr.msra.gmra.mxu1 %vm676_vm0, %v75_v27  ;;  %v1680_v20 = vld [vmem:[%s1950_s3 + $0x94] ss:$8 sps:$4 sm:$0xff]   ;;  %v1687_v27 = vld [vmem:[#allocation4 + $0x30] sm:$0xff]  }
  0x67   :  { %772 = vmatprep.subr.bf16.mxu0 %v1596_v25  ;;  %1063 = vmatpush1.bf16.msra.mxu1 %v1636_v56  ;;  %v1685_v25 = vld [vmem:[#allocation4 + $0x38] sm:$0xff]  }
  0x68   :  { %1064 = vmatprep.subr.bf16.mxu1 %v1641_v58 }
  0x6a   :  { %773 = vmatpush1.bf16.msra.mxu0 %v1594_v28  ;;  %v1688_v28 = vld [vmem:[#allocation4 + $0x68] sm:$0xff]  }
  0x6b   :  { %774 = vmatprep.subr.bf16.mxu0 %v1599_v29  ;;  %1065 = vmatpush1.bf16.msra.mxu1 %v1639_v59  ;;  %v1689_v29 = vld [vmem:[#allocation4 + $0x28] sm:$0xff]  }
  0x6c   :  { %1066 = vmatprep.subr.bf16.mxu1 %v1644_v60 }
  0x6e   :  { %775 = vmatpush1.bf16.msra.mxu0 %v1597_v30  ;;  %v1690_v30 = vld [vmem:[#allocation4 + $0x60] sm:$0xff]  }
  0x6f   :  { %776 = vmatprep.subr.bf16.mxu0 %v1602_v31  ;;  %1067 = vmatpush1.bf16.msra.mxu1 %v1642_v61  ;;  %v1691_v31 = vld [vmem:[#allocation4 + $0x20] sm:$0xff]  }
  0x70   :  { %1068 = vmatprep.subr.bf16.mxu1 %v1647_v62 }
  0x72   :  { %777 = vmatpush1.bf16.msra.mxu0 %v1600_v32  ;;  %v1692_v32 = vld [vmem:[#allocation4 + $0x58] sm:$0xff]  }
  0x73   :  { %778 = vmatprep.subr.bf16.mxu0 %v1605_v33  ;;  %1069 = vmatpush1.bf16.msra.mxu1 %v1645_v63  ;;  %v1693_v33 = vld [vmem:[#allocation4 + $0x18] sm:$0xff]  }
  0x74   :  { %1070 = vmatprep.subr.bf16.mxu1 %v1650_v0 }
  0x76   :  { %779 = vmatpush1.bf16.msra.mxu0 %v1603_v34  ;;  %v176_v34 = vlaneseq }
  0x77   :  { %780 = vmatprep.subr.bf16.mxu0 %v1608_v35  ;;  %1071 = vmatpush1.bf16.msra.mxu1 %v1648_v1 }
  0x78   :  { %1072 = vmatprep.subr.bf16.mxu1 %v1653_v2 }
  0x7a   :  { %781 = vmatpush1.bf16.msra.mxu0 %v1606_v36  ;;  %v177_v36 = vshrl.u32 %v176_v34, 7 }
  0x7b   :  { %782 = vmatprep.subr.bf16.mxu0 %v1611_v37  ;;  %1073 = vmatpush1.bf16.msra.mxu1 %v1651_v3 }
  0x7c   :  { %1074 = vmatprep.subr.bf16.mxu1 %v1656_v4 }
  0x7e   :  { %783 = vmatpush2.bf16.msra.mxu0 %v1609_v38 }
  0x7f   :  { %784 = vmatprep.subr.bf16.mxu0 %v1614_v39  ;;  %1075 = vmatpush1.bf16.msra.mxu1 %v1654_v5  ;;  %v182_v39 = vsub.s32 1, %v177_v36 }
  0x80   :  { %1076 = vmatprep.subr.bf16.mxu1 %v1659_v6 }
  0x82   :  { %785 = vmatpush2.bf16.msra.mxu0 %v1612_v40  ;;  %v174_v40 = vld [vmem:[%s1949_s2] sm:$0x3] }
  0x83   :  { %786 = vmatprep.subr.bf16.mxu0 %v1617_v41  ;;  %1077 = vmatpush1.bf16.msra.mxu1 %v1657_v7  ;;  %v178_v41 = vsub.s32 0, %v177_v36 }
  0x84   :  { %1078 = vmatprep.subr.bf16.mxu1 %v1662_v8 }
  0x86   :  { %787 = vmatpush2.bf16.msra.mxu0 %v1615_v42 }
  0x87   :  { %788 = vmatprep.subr.bf16.mxu0 %v1620_v43  ;;  %1079 = vmatpush2.bf16.msra.mxu1 %v1660_v9 }
  0x88   :  { %1080 = vmatprep.subr.bf16.mxu1 %v1665_v10 }
  0x8a   :  { %789 = vmatpush2.bf16.msra.mxu0 %v1618_v44  ;;  %v183_v44 = vrot.slane %v174_v40, %v182_v39 }
  0x8b   :  { %790 = vmatprep.subr.bf16.mxu0 %v1623_v45  ;;  %1081 = vmatpush2.bf16.msra.mxu1 %v1663_v11  ;;  %v179_v45 = vrot.slane %v174_v40, %v178_v41 }
  0x8c   :  { %1082 = vmatprep.subr.bf16.mxu1 %v1668_v12 }
  0x8e   :  { %791 = vmatpush2.bf16.msra.mxu0 %v1621_v46 }
  0x8f   :  { %792 = vmatprep.subr.bf16.mxu0 %v1626_v47  ;;  %1083 = vmatpush2.bf16.msra.mxu1 %v1666_v13 }
  0x90   :  { %1084 = vmatprep.subr.bf16.mxu1 %v1671_v14 }
  0x92   :  { %793 = vmatpush2.bf16.msra.mxu0 %v1624_v48 }
  0x93   :  { %794 = vmatprep.subr.bf16.mxu0 %v1629_v49  ;;  %1085 = vmatpush2.bf16.msra.mxu1 %v1669_v15  ;;  %v1694_v15 = vld [vmem:[#allocation4 + $0x50] sm:$0xff]  }
  0x94   :  { %1086 = vmatprep.subr.bf16.mxu1 %v1674_v16  ;;  %v1695_v16 = vld [vmem:[#allocation4 + $0x10] sm:$0xff]  }
  0x96   :  { %795 = vmatpush2.bf16.msra.mxu0 %v1627_v50 }
  0x97   :  { %796 = vmatprep.subr.bf16.mxu0 %v1635_v51  ;;  %1087 = vmatpush2.bf16.msra.mxu1 %v1672_v17  ;;  %v1696_v17 = vld [vmem:[#allocation4 + $0x48] sm:$0xff]  }
  0x98   :  { %1088 = vmatprep.subr.bf16.mxu1 %v1677_v18  ;;  %v1697_v18 = vld [vmem:[#allocation4 + $0x8] sm:$0xff]  }
  0x9a   :  { %797 = vmatpush2.bf16.msra.mxu0 %v1633_v52 }
  0x9b   :  { %1089 = vmatpush2.bf16.msra.mxu1 %v1675_v19  ;;  %1460 = vmatprep.subr.bf16.mxu0 %v1684_v24  ;;  %v1698_v19 = vld [vmem:[#allocation4 + $0x40] sm:$0xff]  }
  0x9c   :  { %1090 = vmatprep.subr.bf16.mxu1 %v1680_v20  ;;  %v1699_v20 = vld [vmem:[#allocation4] sm:$0xff]  }
  0x9d   :  { %799 = vmatmul.mubr.bf16.vlgmr.msra.gmra.mxu0 %v73_v55 }
  0x9e   :  { %1461 = vmatpush3.bf16.msra.mxu0 %v1685_v25 }
  0x9f   :  { %1091 = vmatpush2.bf16.msra.mxu1 %v1678_v21  ;;  %1462 = vmatprep.subr.bf16.mxu0 %v1686_v26  ;;  %v890_v21 = vld [vmem:[%s1951_s4] sm:$0x3] }
  0xa0   :  { %1092 = vmatprep.subr.bf16.mxu1 %v1683_v22  ;;  %v895_v24 = vrot.slane %v890_v21, %v178_v41  ;;  %v1434_v41 = vld [vmem:[%s1953_s6] ss:$0 sm:$0xff] }
  0xa2   :  { %1463 = vmatpush3.bf16.msra.mxu0 %v1687_v27 }
  0xa3   :  { %1093 = vmatpush2.bf16.msra.mxu1 %v1681_v23  ;;  %1464 = vmatprep.subr.bf16.mxu0 %v1688_v28  ;;  %v899_v23 = vrot.slane %v890_v21, %v182_v39 }
  0xa6   :  { %1465 = vmatpush3.bf16.msra.mxu0 %v1689_v29 }
  0xa7   :  { %1466 = vmatprep.subr.bf16.mxu0 %v1690_v30 }
  0xaa   :  { %1467 = vmatpush3.bf16.msra.mxu0 %v1691_v31 }
  0xab   :  { %1468 = vmatprep.subr.bf16.mxu0 %v1692_v32 }
  0xae   :  { %1469 = vmatpush3.bf16.msra.mxu0 %v1693_v33 }
  0xaf   :  { %1470 = vmatprep.subr.bf16.mxu0 %v1694_v15 }
  0xb2   :  { %1471 = vmatpush3.bf16.msra.mxu0 %v1695_v16 }
  0xb3   :  { %1472 = vmatprep.subr.bf16.mxu0 %v1696_v17 }
  0xb6   :  { %1473 = vmatpush3.bf16.msra.mxu0 %v1697_v18 }
  0xb7   :  { %1474 = vmatprep.subr.bf16.mxu0 %v1698_v19 }
  0xba   :  { %1475 = vmatpush3.bf16.msra.mxu0 %v1699_v20 }
 0x11d   :  { %v714_v37 = vpop.f32.mrf.mxu0 }
 0x11e   :  { %v757_v35 = vpop.f32.mrf.mxu1  ;;  %v715_v50 = vadd.f32 %v714_v37, %v179_v45 }
 0x11f   :  { %v716_v42 = vpop.f32.mrf.mxu0 }
 0x120   :  { %v759_v38 = vpop.f32.mrf.mxu1  ;;  %v717_v49 = vadd.f32 %v716_v42, %v183_v44  ;;  %v758_v57 = vadd.f32 %v757_v35, %v715_v50 }
 0x121   :  { %v718_v46 = vpop.f32.mrf.mxu0 }
 0x122   :  { %v761_v43 = vpop.f32.mrf.mxu1  ;;  %v719_v52 = vadd.f32 %v718_v46, %v179_v45  ;;  %v760_v55 = vadd.f32 %v759_v38, %v717_v49 }
 0x123   :  { %v720_v51 = vpop.f32.mrf.mxu0 }
 0x124   :  { %v763_v47 = vpop.f32.mrf.mxu1  ;;  %v721_v56 = vadd.f32 %v720_v51, %v183_v44  ;;  %v762_v59 = vadd.f32 %v761_v43, %v719_v52 }
 0x126   :  { %v843_v48 = vpop.f32.mrf.mxu1  ;;  %v764_v0 = vadd.f32 %v763_v47, %v721_v56 }
 0x128   :  { %v845_v53 = vpop.f32.mrf.mxu1 }
 0x12a   :  { %v847_v62 = vpop.f32.mrf.mxu1 }
 0x12c   :  { %v849_v7 = vpop.f32.mrf.mxu1 }
 0x15d   :  { %v800_v54 = vpop.f32.mrf.mxu0 }
 0x15e   :  { %v801_v61 = vadd.f32 %v800_v54, %v758_v57 }
 0x15f   :  { %v802_v58 = vpop.f32.mrf.mxu0 }
 0x160   :  { %v803_v60 = vadd.f32 %v802_v58, %v760_v55  ;;  %v844_v6 = vadd.f32 %v843_v48, %v801_v61 }
 0x161   :  { %v804_v63 = vpop.f32.mrf.mxu0 }
 0x162   :  { %v805_v1 = vadd.f32 %v804_v63, %v762_v59  ;;  %v846_v3 = vadd.f32 %v845_v53, %v803_v60  ;;  %v852_v12 = vmax.f32 %v844_v6, 0.0 }
 0x163   :  { %v806_v2 = vpop.f32.mrf.mxu0 }
 0x164   :  { %v848_v4 = vadd.f32 %v847_v62, %v805_v1  ;;  %v807_v5 = vadd.f32 %v806_v2, %v764_v0  ;;  %v853_v10 = vmax.f32 %v846_v3, 0.0 }
 0x166   :  { %v850_v8 = vadd.f32 %v849_v7, %v807_v5  ;;  %v854_v9 = vmax.f32 %v848_v4, 0.0 }
 0x168   :  { %v855_v11 = vmax.f32 %v850_v8, 0.0  ;;  %v856_v14 = vpack.c.bf16 %v854_v9, %v852_v12 }
 0x16a   :  { %v857_v13 = vpack.c.bf16 %v855_v11, %v853_v10 }
 0x16c   :  { %1094 = vmatprep.mubr.bf16.mxu1 %v857_v13 }
 0x16d   :  { %1095 = vmatmul.mubr.bf16.vlgmr.msra.gmra.mxu1 %v856_v14 }
 0x22d   :  { %v1096_v22 = vpop.f32.mrf.mxu1 }
 0x22e   :  { %v1097_v29 = vadd.f32 %v1096_v22, %v895_v24 }
 0x22f   :  { %v1098_v25 = vpop.f32.mrf.mxu1 }
 0x230   :  { %v1099_v27 = vadd.f32 %v1098_v25, %v899_v23  ;;  %v1105_v35 = vmax.f32 %v1097_v29, 0.0 }
 0x231   :  { %v1100_v26 = vpop.f32.mrf.mxu1 }
 0x232   :  { %v1101_v28 = vadd.f32 %v1100_v26, %v895_v24  ;;  %v1106_v33 = vmax.f32 %v1099_v27, 0.0 }
 0x233   :  { %v1102_v30 = vpop.f32.mrf.mxu1 }
 0x234   :  { %v1103_v31 = vadd.f32 %v1102_v30, %v899_v23  ;;  %v1107_v32 = vmax.f32 %v1101_v28, 0.0 }
 0x236   :  { %v1108_v34 = vmax.f32 %v1103_v31, 0.0  ;;  %v1109_v37 = vpack.c.bf16 %v1107_v32, %v1105_v35 }
 0x238   :  { %v1110_v36 = vpack.c.bf16 %v1108_v34, %v1106_v33 }
 0x23a   :  { %1278 = vmatprep.mubr.bf16.mxu0 %v1110_v36 }
 0x23b   :  { %1279 = vmatmul.mubr.bf16.vlgmr.msra.gmra.mxu0 %v1109_v37 }
 0x2fb   :  { %v1476_v38 = vpop.f32.mrf.mxu0 }
 0x2fd   :  { %v1477_v40 = vpop.f32.mrf.mxu0 }
 0x2fe   :  { %v1478_v39 = vadd.f32 %v1477_v40, %v1476_v38 }
 0x2ff   :  { %v1479_v42 = vpop.f32.mrf.mxu0 }
 0x300   :  { %v1281_v45 = vadd.f32 %v1478_v39, %v1434_v41 }
 0x301   :  { %v1480_v43 = vpop.f32.mrf.mxu0 }
 0x302   :  { %v1481_v44 = vadd.f32 %v1480_v43, %v1479_v42 }
 0x304   :  { %v1284_v46 = vadd.f32 %v1481_v44, %v1434_v41 }
 0x306   :  { %v1458_v47 = vpack.c.bf16 %v1284_v46, %v1281_v45 }
 0x308   :  { %1459 = vst [vmem:[%s1954_s7] sm:$0xff] %v1458_v47  }
 0x309   :  { %1301 = vsyncpa [#allocation3], 1 }
 0x30a   :  { %1302 = vsyncpa [#allocation5], 1 }

</bundles_post_ra>
